<compile_context>
chip_gen: v5e
topology: v5e:2x2
jax: 0.10.0
libtpu: 0.0.40
codegen_flags: <defaults>
</compile_context>

<pallas_src>
import math

import jax
import jax.numpy as jnp
import numpy as np
from jax.experimental import pallas as pl
from jax.experimental.pallas import tpu as pltpu

_BN_EPS = 1e-5
_LANE = 128
_SUBLANE_BF16 = 16   # native bf16 sublane tile


def _round_up(x, m):
    return (x + m - 1) // m * m


def _gelu_exact(x):
    # PyTorch nn.GELU() default: 0.5 * x * (1 + erf(x / sqrt(2))).
    # (Switching to the tanh approximation would move work VALU->EUP; kept exact
    #  to match nn.GELU semantics.)
    return 0.5 * x * (1.0 + jax.lax.erf(x * (1.0 / math.sqrt(2.0))))


def realmlp_kernel(x_ref,
                   w1_ref, b1_ref,   # scale+BN-folded [NTKLinear || skip-proj]: (Din, 2H), (1, 2H)
                   w2_ref, b2_ref,   # BN-folded NTKLinear                     : (H, H),    (1, H)
                   w3_ref, b3_ref,   # final NTKLinear                         : (H, Dout), (1, Dout)
                   out_ref):
    hp = w2_ref.shape[0]

    # Block 1: one MXU pass computes both the (scale+BN)-folded NTKLinear and the
    # scale-folded bias-free skip projection (shared LHS); split along lanes.
    y = jnp.dot(x_ref[...], w1_ref[...], preferred_element_type=jnp.float32) + b1_ref[...]
    h1 = _gelu_exact(y[:, :hp]) + y[:, hp:]          # GELU(z) + proj(x); Dropout = id (eval)

    # Block 2: BN-folded NTKLinear -> GELU, identity skip (H == H).
    y2 = jnp.dot(h1.astype(w2_ref.dtype), w2_ref[...],
                 preferred_element_type=jnp.float32) + b2_ref[...]
    h2 = _gelu_exact(y2) + h1

    # Final NTKLinear(H, Dout); store in the (narrower) output dtype.
    out_ref[...] = (jnp.dot(h2.astype(w3_ref.dtype), w3_ref[...],
                            preferred_element_type=jnp.float32)
                    + b3_ref[...]).astype(out_ref.dtype)


def _fold_bn(w, b, gamma, beta, mean, var):
    """Fold eval-mode BatchNorm1d into the preceding linear (exact algebra)."""
    s = gamma / jnp.sqrt(var + _BN_EPS)              # (1, H)
    return w * s, (b - mean) * s + beta


def _pad2(a, rows, cols):
    return jnp.pad(a, ((0, rows - a.shape[0]), (0, cols - a.shape[1])))


def _usable_vmem_bytes():
    try:
        cap = int(pltpu.get_tpu_info().vmem_capacity_bytes)
    except Exception:
        cap = 64 << 20                     # conservative (v7x-sized) fallback
    return int(cap * 0.78)                 # ~100 MiB on v5e/v6e, ~50 MiB on v7x


def _num_tensorcores():
    try:
        return max(1, int(getattr(jax.devices()[0], "num_cores", 1) or 1))
    except Exception:
        return 1


def realmlp_forward(x, params, *, tile_b_max=1024,
                    compute_dtype=jnp.bfloat16, out_dtype=jnp.bfloat16):
    B, din = x.shape
    h = params["w1"].shape[1]
    dout = params["w3"].shape[1]

    dinp = _round_up(din, _LANE)
    hp = _round_up(h, _LANE)
    doutp = _round_up(dout, _LANE)

    # ---- wrapper-side prep: fold BN into w1/w2, fold the ScalingLayer into both
    # halves of the fused block-1 weight (x @ (s.T*W) == (x*s) @ W), zero-pad to
    # lane-dense shapes, cast matmul operands to bf16 (f32 accumulation in-kernel).
    w1f, b1f = _fold_bn(params["w1"], params["b1"], params["g1"], params["be1"],
                        params["m1"], params["v1"])
    w2f, b2f = _fold_bn(params["w2"], params["b2"], params["g2"], params["be2"],
                        params["m2"], params["v2"])
    scale_col = params["scale"].reshape(din, 1)

    w1_p = jnp.concatenate([_pad2(w1f * scale_col, dinp, hp),
                            _pad2(params["wp1"] * scale_col, dinp, hp)],
                           axis=1).astype(compute_dtype)
    b1_p = jnp.concatenate([_pad2(b1f, 1, hp),
                            jnp.zeros((1, hp), jnp.float32)], axis=1)
    w2_p = _pad2(w2f, hp, hp).astype(compute_dtype)
    b2_p = _pad2(b2f, 1, hp)
    w3_p = _pad2(params["w3"], hp, doutp).astype(compute_dtype)
    b3_p = _pad2(params["b3"], 1, doutp)

    weights = (w1_p, b1_p, w2_p, b2_p, w3_p, b3_p)
    weight_bytes = sum(int(a.size) * a.dtype.itemsize for a in weights)

    # ---- batch tiling: 16-row aligned (bf16 sublane packing), capped by the
    # hardware VMEM budget (weights single-buffered, x/out double-buffered), and
    # split so the "parallel" batch axis covers every TensorCore on the chip.
    usable_vmem = _usable_vmem_bytes()
    x_isz = jnp.dtype(compute_dtype).itemsize
    o_isz = jnp.dtype(out_dtype).itemsize
    per_row = (2 * dinp * x_isz                 # double-buffered x tile
               + 2 * doutp * o_isz              # double-buffered out tile
               + 4 * (4 * hp + 2 * doutp))      # f32 intermediates (y, h1, y2/h2, out)
    budget = usable_vmem - weight_bytes - (4 << 20)
    tile_cap = max(_SUBLANE_BF16,
                   (budget // max(per_row, 1)) // _SUBLANE_BF16 * _SUBLANE_BF16)
    tile_limit = max(_SUBLANE_BF16, min(tile_b_max, tile_cap))

    b16 = _round_up(max(B, 1), _SUBLANE_BF16)
    n_tiles = pl.cdiv(b16, tile_limit)
    n_tiles = max(n_tiles, min(_num_tensorcores(), b16 // _SUBLANE_BF16))
    tile_b = _round_up(pl.cdiv(b16, n_tiles), _SUBLANE_BF16)
    bp = _round_up(b16, tile_b)
    grid = (bp // tile_b,)

    x_p = _pad2(x, bp, dinp).astype(compute_dtype)
    operands = (x_p,) + weights

    flops = 2 * bp * (dinp * 2 * hp + hp * hp + hp * doutp)
    transcendentals = 2 * bp * hp               # two erf-GELUs over the hidden dim
    bytes_accessed = (sum(int(a.size) * a.dtype.itemsize for a in operands)
                      + bp * doutp * o_isz)

    def build(single_buffer_weights):
        def whole(shape):
            # Grid-invariant weights/biases: constant index_map; single-buffered to
            # reclaim the VMEM Pallas would otherwise spend double-buffering them.
            if single_buffer_weights:
                return pl.BlockSpec(shape, lambda i: (0, 0),
                                    pipeline_mode=pl.Buffered(1))
            return pl.BlockSpec(shape, lambda i: (0, 0))

        in_specs = [
            pl.BlockSpec((tile_b, dinp), lambda i: (i, 0)),   # x, tiled over batch
            whole((dinp, 2 * hp)), whole((1, 2 * hp)),        # fused block-1 weights / bias
            whole((hp, hp)), whole((1, hp)),                  # block-2
            whole((hp, doutp)), whole((1, doutp)),            # final
        ]
        return pl.pallas_call(
            realmlp_kernel,
            out_shape=jax.ShapeDtypeStruct((bp, doutp), out_dtype),
            grid=grid,
            in_specs=in_specs,
            out_specs=pl.BlockSpec((tile_b, doutp), lambda i: (i, 0)),
            compiler_params=pltpu.CompilerParams(
                dimension_semantics=("parallel",),
                vmem_limit_bytes=usable_vmem),
            cost_estimate=pl.CostEstimate(flops=flops,
                                          transcendentals=transcendentals,
                                          bytes_accessed=bytes_accessed),
        )

    try:
        out = build(True)(*operands)
    except Exception:
        # TODO(synk): pl.Buffered(1) unsupported on this jax version -> fall back to
        # default double-buffered weights (correctness identical, more VMEM).
        out = build(False)(*operands)

    return out[:B, :dout]


def init_params(key, din, h, dout):
    """Deterministic init mirroring the PyTorch module's reset_parameters (eval mode)."""
    ks = list(jax.random.split(key, 8))

    def ntk_linear(kw, kb, fan_in, fan_out):
        # kaiming_uniform(a=sqrt(5)) -> bound 1/sqrt(fan_in), then weights /= sqrt(fan_in)
        wb = 1.0 / fan_in
        w = jax.random.uniform(kw, (fan_in, fan_out), jnp.float32, -wb, wb)
        bb = 1.0 / math.sqrt(fan_in)
        b = jax.random.uniform(kb, (1, fan_out), jnp.float32, -bb, bb)
        return w, b

    def plain_linear_nobias(kw, fan_in, fan_out):
        wb = 1.0 / math.sqrt(fan_in)
        return jax.random.uniform(kw, (fan_in, fan_out), jnp.float32, -wb, wb)

    w1, b1 = ntk_linear(ks[0], ks[1], din, h)
    wp1 = plain_linear_nobias(ks[2], din, h)
    w2, b2 = ntk_linear(ks[3], ks[4], h, h)
    w3, b3 = ntk_linear(ks[5], ks[6], h, dout)

    ones_h = jnp.ones((1, h), jnp.float32)
    zeros_h = jnp.zeros((1, h), jnp.float32)

    return dict(
        scale=jnp.ones((1, din), jnp.float32),           # ScalingLayer init = ones
        w1=w1, b1=b1, g1=ones_h, be1=zeros_h, m1=zeros_h, v1=ones_h, wp1=wp1,
        w2=w2, b2=b2, g2=ones_h, be2=zeros_h, m2=zeros_h, v2=ones_h,
        w3=w3, b3=b3,
    )


def realmlp_reference(x, p):
    """Pure-JAX f32 reference of the module forward (eval mode)."""
    h = x * p["scale"]
    z = h @ p["w1"] + p["b1"]
    z = (z - p["m1"]) / jnp.sqrt(p["v1"] + _BN_EPS) * p["g1"] + p["be1"]
    z = jax.nn.gelu(z, approximate=False)
    h1 = z + h @ p["wp1"]
    z = h1 @ p["w2"] + p["b2"]
    z = (z - p["m2"]) / jnp.sqrt(p["v2"] + _BN_EPS) * p["g2"] + p["be2"]
    z = jax.nn.gelu(z, approximate=False)
    h2 = z + h1
    return h2 @ p["w3"] + p["b3"]


if __name__ == "__main__":
    key = jax.random.PRNGKey(0)
    kx, kp = jax.random.split(key)

    BATCH, DIN, HIDDEN, DOUT = 16, 16, 32, 8
    x = jax.random.normal(kx, (BATCH, DIN), jnp.float32)
    params = init_params(kp, DIN, HIDDEN, DOUT)

    out = jax.block_until_ready(realmlp_forward(x, params))
    ref = jax.block_until_ready(realmlp_reference(x, params))

    # bf16 matmul operands + bf16 output vs. f32 reference -> loose tolerance.
    np.testing.assert_allclose(np.asarray(out.astype(jnp.float32)), np.asarray(ref),
                               rtol=2e-2, atol=2e-2)

    print("KERNEL_OK")
</pallas_src>

<mosaic_0001>
module attributes {stable_mosaic.version = 11 : i64} {
  func.func @realmlp_kernel(%arg0: i32, %arg1: memref<16x128xbf16, #tpu.memory_space<vmem>>, %arg2: memref<128x256xbf16, #tpu.memory_space<vmem>>, %arg3: memref<1x256xf32, #tpu.memory_space<vmem>>, %arg4: memref<128x128xbf16, #tpu.memory_space<vmem>>, %arg5: memref<1x128xf32, #tpu.memory_space<vmem>>, %arg6: memref<128x128xbf16, #tpu.memory_space<vmem>>, %arg7: memref<1x128xf32, #tpu.memory_space<vmem>>, %arg8: memref<16x128xbf16, #tpu.memory_space<vmem>>) attributes {dimension_semantics = [#tpu.dimension_semantics<parallel>], iteration_bounds = array<i64: 1>, scalar_prefetch = 0 : i64, scratch_operands = 0 : i64, tpu.core_type = #tpu.core_type<tc>, window_params = [{transform_indices = @transform_0, window_bounds = array<i64: 16, 128>}, {pipeline_mode = #tpu.pipeline_mode<synchronous>, transform_indices = @transform_1, window_bounds = array<i64: 128, 256>}, {pipeline_mode = #tpu.pipeline_mode<synchronous>, transform_indices = @transform_2, window_bounds = array<i64: 1, 256>}, {pipeline_mode = #tpu.pipeline_mode<synchronous>, transform_indices = @transform_3, window_bounds = array<i64: 128, 128>}, {pipeline_mode = #tpu.pipeline_mode<synchronous>, transform_indices = @transform_4, window_bounds = array<i64: 1, 128>}, {pipeline_mode = #tpu.pipeline_mode<synchronous>, transform_indices = @transform_5, window_bounds = array<i64: 128, 128>}, {pipeline_mode = #tpu.pipeline_mode<synchronous>, transform_indices = @transform_6, window_bounds = array<i64: 1, 128>}, {transform_indices = @transform_7, window_bounds = array<i64: 16, 128>}]} {
    %c0 = arith.constant 0 : index
    %c0_0 = arith.constant 0 : index
    %0 = vector.load %arg1[%c0, %c0_0] : memref<16x128xbf16, #tpu.memory_space<vmem>>, vector<16x128xbf16>
    %c0_1 = arith.constant 0 : index
    %c0_2 = arith.constant 0 : index
    %1 = vector.load %arg2[%c0_1, %c0_2] : memref<128x256xbf16, #tpu.memory_space<vmem>>, vector<128x256xbf16>
    %cst = arith.constant dense<0.000000e+00> : vector<16x256xf32>
    %2 = tpu.matmul %0, %1, %cst {dimension_numbers = #tpu.dot_dimension_numbers<[1], [0], [0], [1], [0, 0, 1, 1], [], []>} : vector<16x128xbf16>, vector<128x256xbf16>, vector<16x256xf32> -> vector<16x256xf32>
    %c0_3 = arith.constant 0 : index
    %c0_4 = arith.constant 0 : index
    %3 = vector.load %arg3[%c0_3, %c0_4] : memref<1x256xf32, #tpu.memory_space<vmem>>, vector<1x256xf32>
    %4 = vector.broadcast %3 : vector<1x256xf32> to vector<16x256xf32>
    %5 = arith.addf %2, %4 : vector<16x256xf32>
    %6 = vector.extract_strided_slice %5 {offsets = [0, 0], sizes = [16, 128], strides = [1, 1]} : vector<16x256xf32> to vector<16x128xf32>
    %cst_5 = arith.constant 5.000000e-01 : f32
    %7 = vector.broadcast %cst_5 : f32 to vector<16x128xf32>
    %8 = arith.mulf %7, %6 : vector<16x128xf32>
    %cst_6 = arith.constant 0.707106769 : f32
    %9 = vector.broadcast %cst_6 : f32 to vector<16x128xf32>
    %10 = arith.mulf %6, %9 : vector<16x128xf32>
    %11 = math.erf %10 : vector<16x128xf32>
    %cst_7 = arith.constant 1.000000e+00 : f32
    %12 = vector.broadcast %cst_7 : f32 to vector<16x128xf32>
    %13 = arith.addf %12, %11 : vector<16x128xf32>
    %14 = arith.mulf %8, %13 : vector<16x128xf32>
    %15 = vector.extract_strided_slice %5 {offsets = [0, 128], sizes = [16, 128], strides = [1, 1]} : vector<16x256xf32> to vector<16x128xf32>
    %16 = arith.addf %14, %15 : vector<16x128xf32>
    %17 = arith.truncf %16 : vector<16x128xf32> to vector<16x128xbf16>
    %c0_8 = arith.constant 0 : index
    %c0_9 = arith.constant 0 : index
    %18 = vector.load %arg4[%c0_8, %c0_9] : memref<128x128xbf16, #tpu.memory_space<vmem>>, vector<128x128xbf16>
    %cst_10 = arith.constant dense<0.000000e+00> : vector<16x128xf32>
    %19 = tpu.matmul %17, %18, %cst_10 {dimension_numbers = #tpu.dot_dimension_numbers<[1], [0], [0], [1], [0, 0, 1, 1], [], []>} : vector<16x128xbf16>, vector<128x128xbf16>, vector<16x128xf32> -> vector<16x128xf32>
    %c0_11 = arith.constant 0 : index
    %c0_12 = arith.constant 0 : index
    %20 = vector.load %arg5[%c0_11, %c0_12] : memref<1x128xf32, #tpu.memory_space<vmem>>, vector<1x128xf32>
    %21 = vector.broadcast %20 : vector<1x128xf32> to vector<16x128xf32>
    %22 = arith.addf %19, %21 : vector<16x128xf32>
    %cst_13 = arith.constant 5.000000e-01 : f32
    %23 = vector.broadcast %cst_13 : f32 to vector<16x128xf32>
    %24 = arith.mulf %23, %22 : vector<16x128xf32>
    %cst_14 = arith.constant 0.707106769 : f32
    %25 = vector.broadcast %cst_14 : f32 to vector<16x128xf32>
    %26 = arith.mulf %22, %25 : vector<16x128xf32>
    %27 = math.erf %26 : vector<16x128xf32>
    %cst_15 = arith.constant 1.000000e+00 : f32
    %28 = vector.broadcast %cst_15 : f32 to vector<16x128xf32>
    %29 = arith.addf %28, %27 : vector<16x128xf32>
    %30 = arith.mulf %24, %29 : vector<16x128xf32>
    %31 = arith.addf %30, %16 : vector<16x128xf32>
    %32 = arith.truncf %31 : vector<16x128xf32> to vector<16x128xbf16>
    %c0_16 = arith.constant 0 : index
    %c0_17 = arith.constant 0 : index
    %33 = vector.load %arg6[%c0_16, %c0_17] : memref<128x128xbf16, #tpu.memory_space<vmem>>, vector<128x128xbf16>
    %cst_18 = arith.constant dense<0.000000e+00> : vector<16x128xf32>
    %34 = tpu.matmul %32, %33, %cst_18 {dimension_numbers = #tpu.dot_dimension_numbers<[1], [0], [0], [1], [0, 0, 1, 1], [], []>} : vector<16x128xbf16>, vector<128x128xbf16>, vector<16x128xf32> -> vector<16x128xf32>
    %c0_19 = arith.constant 0 : index
    %c0_20 = arith.constant 0 : index
    %35 = vector.load %arg7[%c0_19, %c0_20] : memref<1x128xf32, #tpu.memory_space<vmem>>, vector<1x128xf32>
    %36 = vector.broadcast %35 : vector<1x128xf32> to vector<16x128xf32>
    %37 = arith.addf %34, %36 : vector<16x128xf32>
    %38 = arith.truncf %37 : vector<16x128xf32> to vector<16x128xbf16>
    %c0_21 = arith.constant 0 : index
    %c0_22 = arith.constant 0 : index
    %39 = vector.load %arg8[%c0_21, %c0_22] : memref<16x128xbf16, #tpu.memory_space<vmem>>, vector<16x128xbf16>
    tpu.vector_store %arg8[%c0_21, %c0_22], %38 {strides = array<i32>} : memref<16x128xbf16, #tpu.memory_space<vmem>>, vector<16x128xbf16>,
    return
  }
  func.func @transform_0(%arg0: i32) -> (i32, i32) {
    %c0_i32 = arith.constant 0 : i32
    %c0_i32_0 = arith.constant 0 : i32
    return %arg0, %c0_i32 : i32, i32
  }
  func.func @transform_1(%arg0: i32) -> (i32, i32) {
    %c0_i32 = arith.constant 0 : i32
    %c0_i32_0 = arith.constant 0 : i32
    %c0_i32_1 = arith.constant 0 : i32
    return %c0_i32, %c0_i32_0 : i32, i32
  }
  func.func @transform_2(%arg0: i32) -> (i32, i32) {
    %c0_i32 = arith.constant 0 : i32
    %c0_i32_0 = arith.constant 0 : i32
    %c0_i32_1 = arith.constant 0 : i32
    return %c0_i32, %c0_i32_0 : i32, i32
  }
  func.func @transform_3(%arg0: i32) -> (i32, i32) {
    %c0_i32 = arith.constant 0 : i32
    %c0_i32_0 = arith.constant 0 : i32
    %c0_i32_1 = arith.constant 0 : i32
    return %c0_i32, %c0_i32_0 : i32, i32
  }
  func.func @transform_4(%arg0: i32) -> (i32, i32) {
    %c0_i32 = arith.constant 0 : i32
    %c0_i32_0 = arith.constant 0 : i32
    %c0_i32_1 = arith.constant 0 : i32
    return %c0_i32, %c0_i32_0 : i32, i32
  }
  func.func @transform_5(%arg0: i32) -> (i32, i32) {
    %c0_i32 = arith.constant 0 : i32
    %c0_i32_0 = arith.constant 0 : i32
    %c0_i32_1 = arith.constant 0 : i32
    return %c0_i32, %c0_i32_0 : i32, i32
  }
  func.func @transform_6(%arg0: i32) -> (i32, i32) {
    %c0_i32 = arith.constant 0 : i32
    %c0_i32_0 = arith.constant 0 : i32
    %c0_i32_1 = arith.constant 0 : i32
    return %c0_i32, %c0_i32_0 : i32, i32
  }
  func.func @transform_7(%arg0: i32) -> (i32, i32) {
    %c0_i32 = arith.constant 0 : i32
    %c0_i32_0 = arith.constant 0 : i32
    return %arg0, %c0_i32 : i32, i32
  }
}

module attributes {stable_mosaic.version = 11 : i64} {
  func.func @realmlp_kernel(%arg0: i32, %arg1: memref<16x128xbf16, #tpu.memory_space<vmem>>, %arg2: memref<128x256xbf16, #tpu.memory_space<vmem>>, %arg3: memref<1x256xf32, #tpu.memory_space<vmem>>, %arg4: memref<128x128xbf16, #tpu.memory_space<vmem>>, %arg5: memref<1x128xf32, #tpu.memory_space<vmem>>, %arg6: memref<128x128xbf16, #tpu.memory_space<vmem>>, %arg7: memref<1x128xf32, #tpu.memory_space<vmem>>, %arg8: memref<16x128xbf16, #tpu.memory_space<vmem>>) attributes {dimension_semantics = [#tpu.dimension_semantics<parallel>], iteration_bounds = array<i64: 1>, scalar_prefetch = 0 : i64, scratch_operands = 0 : i64, tpu.core_type = #tpu.core_type<tc>, window_params = [{transform_indices = @transform_0, window_bounds = array<i64: 16, 128>}, {pipeline_mode = #tpu.pipeline_mode<synchronous>, transform_indices = @transform_1, window_bounds = array<i64: 128, 256>}, {pipeline_mode = #tpu.pipeline_mode<synchronous>, transform_indices = @transform_2, window_bounds = array<i64: 1, 256>}, {pipeline_mode = #tpu.pipeline_mode<synchronous>, transform_indices = @transform_3, window_bounds = array<i64: 128, 128>}, {pipeline_mode = #tpu.pipeline_mode<synchronous>, transform_indices = @transform_4, window_bounds = array<i64: 1, 128>}, {pipeline_mode = #tpu.pipeline_mode<synchronous>, transform_indices = @transform_5, window_bounds = array<i64: 128, 128>}, {pipeline_mode = #tpu.pipeline_mode<synchronous>, transform_indices = @transform_6, window_bounds = array<i64: 1, 128>}, {transform_indices = @transform_7, window_bounds = array<i64: 16, 128>}]} {
    %c0 = arith.constant 0 : index
    %c0_0 = arith.constant 0 : index
    %0 = vector.load %arg1[%c0, %c0_0] : memref<16x128xbf16, #tpu.memory_space<vmem>>, vector<16x128xbf16>
    %c0_1 = arith.constant 0 : index
    %c0_2 = arith.constant 0 : index
    %1 = vector.load %arg2[%c0_1, %c0_2] : memref<128x256xbf16, #tpu.memory_space<vmem>>, vector<128x256xbf16>
    %cst = arith.constant dense<0.000000e+00> : vector<16x256xf32>
    %2 = tpu.matmul %0, %1, %cst {dimension_numbers = #tpu.dot_dimension_numbers<[1], [0], [0], [1], [0, 0, 1, 1], [], []>} : vector<16x128xbf16>, vector<128x256xbf16>, vector<16x256xf32> -> vector<16x256xf32>
    %c0_3 = arith.constant 0 : index
    %c0_4 = arith.constant 0 : index
    %3 = vector.load %arg3[%c0_3, %c0_4] : memref<1x256xf32, #tpu.memory_space<vmem>>, vector<1x256xf32>
    %4 = vector.broadcast %3 : vector<1x256xf32> to vector<16x256xf32>
    %5 = arith.addf %2, %4 : vector<16x256xf32>
    %6 = vector.extract_strided_slice %5 {offsets = [0, 0], sizes = [16, 128], strides = [1, 1]} : vector<16x256xf32> to vector<16x128xf32>
    %cst_5 = arith.constant 5.000000e-01 : f32
    %7 = vector.broadcast %cst_5 : f32 to vector<16x128xf32>
    %8 = arith.mulf %7, %6 : vector<16x128xf32>
    %cst_6 = arith.constant 0.707106769 : f32
    %9 = vector.broadcast %cst_6 : f32 to vector<16x128xf32>
    %10 = arith.mulf %6, %9 : vector<16x128xf32>
    %11 = math.erf %10 : vector<16x128xf32>
    %cst_7 = arith.constant 1.000000e+00 : f32
    %12 = vector.broadcast %cst_7 : f32 to vector<16x128xf32>
    %13 = arith.addf %12, %11 : vector<16x128xf32>
    %14 = arith.mulf %8, %13 : vector<16x128xf32>
    %15 = vector.extract_strided_slice %5 {offsets = [0, 128], sizes = [16, 128], strides = [1, 1]} : vector<16x256xf32> to vector<16x128xf32>
    %16 = arith.addf %14, %15 : vector<16x128xf32>
    %17 = arith.truncf %16 : vector<16x128xf32> to vector<16x128xbf16>
    %c0_8 = arith.constant 0 : index
    %c0_9 = arith.constant 0 : index
    %18 = vector.load %arg4[%c0_8, %c0_9] : memref<128x128xbf16, #tpu.memory_space<vmem>>, vector<128x128xbf16>
    %cst_10 = arith.constant dense<0.000000e+00> : vector<16x128xf32>
    %19 = tpu.matmul %17, %18, %cst_10 {dimension_numbers = #tpu.dot_dimension_numbers<[1], [0], [0], [1], [0, 0, 1, 1], [], []>} : vector<16x128xbf16>, vector<128x128xbf16>, vector<16x128xf32> -> vector<16x128xf32>
    %c0_11 = arith.constant 0 : index
    %c0_12 = arith.constant 0 : index
    %20 = vector.load %arg5[%c0_11, %c0_12] : memref<1x128xf32, #tpu.memory_space<vmem>>, vector<1x128xf32>
    %21 = vector.broadcast %20 : vector<1x128xf32> to vector<16x128xf32>
    %22 = arith.addf %19, %21 : vector<16x128xf32>
    %cst_13 = arith.constant 5.000000e-01 : f32
    %23 = vector.broadcast %cst_13 : f32 to vector<16x128xf32>
    %24 = arith.mulf %23, %22 : vector<16x128xf32>
    %cst_14 = arith.constant 0.707106769 : f32
    %25 = vector.broadcast %cst_14 : f32 to vector<16x128xf32>
    %26 = arith.mulf %22, %25 : vector<16x128xf32>
    %27 = math.erf %26 : vector<16x128xf32>
    %cst_15 = arith.constant 1.000000e+00 : f32
    %28 = vector.broadcast %cst_15 : f32 to vector<16x128xf32>
    %29 = arith.addf %28, %27 : vector<16x128xf32>
    %30 = arith.mulf %24, %29 : vector<16x128xf32>
    %31 = arith.addf %30, %16 : vector<16x128xf32>
    %32 = arith.truncf %31 : vector<16x128xf32> to vector<16x128xbf16>
    %c0_16 = arith.constant 0 : index
    %c0_17 = arith.constant 0 : index
    %33 = vector.load %arg6[%c0_16, %c0_17] : memref<128x128xbf16, #tpu.memory_space<vmem>>, vector<128x128xbf16>
    %cst_18 = arith.constant dense<0.000000e+00> : vector<16x128xf32>
    %34 = tpu.matmul %32, %33, %cst_18 {dimension_numbers = #tpu.dot_dimension_numbers<[1], [0], [0], [1], [0, 0, 1, 1], [], []>} : vector<16x128xbf16>, vector<128x128xbf16>, vector<16x128xf32> -> vector<16x128xf32>
    %c0_19 = arith.constant 0 : index
    %c0_20 = arith.constant 0 : index
    %35 = vector.load %arg7[%c0_19, %c0_20] : memref<1x128xf32, #tpu.memory_space<vmem>>, vector<1x128xf32>
    %36 = vector.broadcast %35 : vector<1x128xf32> to vector<16x128xf32>
    %37 = arith.addf %34, %36 : vector<16x128xf32>
    %38 = arith.truncf %37 : vector<16x128xf32> to vector<16x128xbf16>
    %c0_21 = arith.constant 0 : index
    %c0_22 = arith.constant 0 : index
    %39 = vector.load %arg8[%c0_21, %c0_22] : memref<16x128xbf16, #tpu.memory_space<vmem>>, vector<16x128xbf16>
    tpu.vector_store %arg8[%c0_21, %c0_22], %38 {strides = array<i32>} : memref<16x128xbf16, #tpu.memory_space<vmem>>, vector<16x128xbf16>,
    return
  }
  func.func @transform_0(%arg0: i32) -> (i32, i32) {
    %c0_i32 = arith.constant 0 : i32
    %c0_i32_0 = arith.constant 0 : i32
    return %arg0, %c0_i32 : i32, i32
  }
  func.func @transform_1(%arg0: i32) -> (i32, i32) {
    %c0_i32 = arith.constant 0 : i32
    %c0_i32_0 = arith.constant 0 : i32
    %c0_i32_1 = arith.constant 0 : i32
    return %c0_i32, %c0_i32_0 : i32, i32
  }
  func.func @transform_2(%arg0: i32) -> (i32, i32) {
    %c0_i32 = arith.constant 0 : i32
    %c0_i32_0 = arith.constant 0 : i32
    %c0_i32_1 = arith.constant 0 : i32
    return %c0_i32, %c0_i32_0 : i32, i32
  }
  func.func @transform_3(%arg0: i32) -> (i32, i32) {
    %c0_i32 = arith.constant 0 : i32
    %c0_i32_0 = arith.constant 0 : i32
    %c0_i32_1 = arith.constant 0 : i32
    return %c0_i32, %c0_i32_0 : i32, i32
  }
  func.func @transform_4(%arg0: i32) -> (i32, i32) {
    %c0_i32 = arith.constant 0 : i32
    %c0_i32_0 = arith.constant 0 : i32
    %c0_i32_1 = arith.constant 0 : i32
    return %c0_i32, %c0_i32_0 : i32, i32
  }
  func.func @transform_5(%arg0: i32) -> (i32, i32) {
    %c0_i32 = arith.constant 0 : i32
    %c0_i32_0 = arith.constant 0 : i32
    %c0_i32_1 = arith.constant 0 : i32
    return %c0_i32, %c0_i32_0 : i32, i32
  }
  func.func @transform_6(%arg0: i32) -> (i32, i32) {
    %c0_i32 = arith.constant 0 : i32
    %c0_i32_0 = arith.constant 0 : i32
    %c0_i32_1 = arith.constant 0 : i32
    return %c0_i32, %c0_i32_0 : i32, i32
  }
  func.func @transform_7(%arg0: i32) -> (i32, i32) {
    %c0_i32 = arith.constant 0 : i32
    %c0_i32_0 = arith.constant 0 : i32
    return %arg0, %c0_i32 : i32, i32
  }
}

</mosaic_0001>

<bundles_post_ra>
// kernel: tpu_custom_call.1
= control target key start
LH: loop header
LB: loop body
LE: loop exit
PB: predicated region body
PF: predicated region fallthrough
CT: control target
= control target key end

     0   :  { %12 = vsyncpa [#allocation3], 0  ;;  %s1092_s0 = inlined_call_operand.hbm [shape: bf16[16,128], index: 0, kind: input, shape index: {}]   ;;  %s1093_s1 = inlined_call_operand.hbm [shape: bf16[128,256], index: 1, kind: input, shape index: {}]   ;;  %s1094_s2 = inlined_call_operand.hbm [shape: f32[1,256], index: 2, kind: input, shape index: {}]   ;;  %s1095_s3 = inlined_call_operand.hbm [shape: bf16[128,128], index: 3, kind: input, shape index: {}]   ;;  %s1096_s4 = inlined_call_operand.vmem [shape: f32[1,128], index: 4, kind: input, shape index: {}]   ;;  %s1097_s5 = inlined_call_operand.hbm [shape: bf16[128,128], index: 5, kind: input, shape index: {}]   ;;  %s1098_s6 = inlined_call_operand.vmem [shape: f32[1,128], index: 6, kind: input, shape index: {}]   ;;  %s1099_s7 = inlined_call_operand.hbm [shape: bf16[16,128], index: 7, kind: output, shape index: {}]  }
   0x1   :  { %13 = vsyncpa [#allocation6], 0 }
   0x2   :  { %14 = vsyncpa [#allocation9], 0  ;;  %s33_s26 = sshll.u32 %s1093_s1, 4  ;;  %s34_s26 = int_to_ptr.hbm [resolvable:$true] %s33_s26 }
   0x3   :  { %15 = vsyncpa [#allocation4], 0  ;;  %s958_s27 = smov [#allocation5]   ;;  %s959_s29 = smov 128  }
   0x4   :  { %s35_s28 = sshll.u32 %s958_s27, 4  ;;  %s960_s30 = smov 8   ;;  %s36_s28 = int_to_ptr.vmem [resolvable:$true] %s35_s28 }
   0x5   :  { %41 = dma.hbm_to_vmem [thread:$0]  %s34_s26, 2048, %s36_s28, [#allocation6], %s959_s29, %s959_s29, %s960_s30  }
   0x6   :  { %s57_s10 = sshll.u32 %s1095_s3, 4  ;;  %s961_s11 = smov [#allocation8]   ;;  %s58_s10 = int_to_ptr.hbm [resolvable:$true] %s57_s10 }
   0x7   :  { %s59_s12 = sshll.u32 %s961_s11, 4  ;;  %s20_s15 = sshll.u32 %s1092_s0, 4  ;;  %s60_s12 = int_to_ptr.vmem [resolvable:$true] %s59_s12  ;;  %s21_s15 = int_to_ptr.hbm [resolvable:$true] %s20_s15 }
   0x8   :  { %s962_s1 = smov 64   ;;  %s963_s16 = smov 4  }
   0x9   :  { %65 = dma.hbm_to_vmem [thread:$0]  %s58_s10, 1024, %s60_s12, [#allocation9], %s962_s1, %s962_s1, %s963_s16  }
   0xa   :  { %s47_s19 = sshll.u32 %s1094_s2, 4  ;;  %s964_s3 = smov [#allocation2]   ;;  %s48_s19 = int_to_ptr.hbm [resolvable:$true] %s47_s19 }
   0xb   :  { %s22_s20 = sshll.u32 %s964_s3, 4  ;;  %s965_s0 = smov [#allocation7]   ;;  %s23_s20 = int_to_ptr.vmem [resolvable:$true] %s22_s20 }
   0xc   :  { %28 = dma.hbm_to_vmem [thread:$0]  %s21_s15, 128, %s23_s20, [#allocation3], %s962_s1, %s962_s1, %s963_s16  }
   0xd   :  { %s49_s21 = sshll.u32 %s965_s0, 4  ;;  %s72_s24 = sshll.u32 %s1097_s5, 4  ;;  %s50_s21 = int_to_ptr.vmem [resolvable:$true] %s49_s21  ;;  %s73_s24 = int_to_ptr.hbm [resolvable:$true] %s72_s24 }
   0xe   :  { %52 = dma.hbm_to_vmem [thread:$0]  %s48_s19, 32, %s50_s21, [#allocation6]  }
   0xf   :  { %s966_s25 = smov [#allocation10]  }
  0x10   :  { %s74_s26 = sshll.u32 %s966_s25, 4  ;;  %s75_s26 = int_to_ptr.vmem [resolvable:$true] %s74_s26 }
  0x11   :  { %80 = dma.hbm_to_vmem [thread:$0]  %s73_s24, 1024, %s75_s26, [#allocation9], %s962_s1, %s962_s1, %s963_s16  }
  0x12   :  { %950 = dma.done.wait [#allocation3], 128  }
  0x13   :  { %951 = vsyncadd [#allocation3], 4294967168 }
  0x14   :  { %952 = dma.done.wait [#allocation6], 2080  }
  0x15   :  { %953 = vsyncadd [#allocation6], 4294965216 }
  0x16   :  { %954 = dma.done.wait [#allocation9], 2048  }
  0x17   :  { %955 = vsyncadd [#allocation9], 4294965248  ;;  %v674_v0 = vld [vmem:[#allocation5 + $0x70] sm:$0xf]  ;;  %v764_v1 = vld [vmem:[#allocation5 + $0x74] sm:$0xf0] }
  0x18   :  { %v666_v2 = vld [vmem:[#allocation5 + $0x60] sm:$0xf]  ;;  %v675_v3 = vor.u32 %v764_v1, %v674_v0  ;;  %v762_v4 = vld [vmem:[#allocation5 + $0x64] sm:$0xf0]  ;;  %v658_v6 = vld [vmem:[#allocation5 + $0x50] sm:$0xf] }
  0x19   :  { %v667_v5 = vor.u32 %v762_v4, %v666_v2  ;;  %v760_v7 = vld [vmem:[#allocation5 + $0x54] sm:$0xf0]  ;;  %v763_v8 = vld [vmem:[#allocation5 + $0x74] sm:$0xf]  ;;  %v676_v9 = vld [vmem:[#allocation5 + $0x78] sm:$0xf0] }
  0x1a   :  { %213 = vmatpush.bf16.msra.mxu0 %v675_v3  ;;  %v761_v10 = vld [vmem:[#allocation5 + $0x64] sm:$0xf]  ;;  %v668_v11 = vld [vmem:[#allocation5 + $0x68] sm:$0xf0]  ;;  %v659_v12 = vor.u32 %v760_v7, %v658_v6  ;;  %v679_v13 = vor.u32 %v763_v8, %v676_v9  ;;  %v650_v14 = vld [vmem:[#allocation5 + $0x40] sm:$0xf] }
  0x1b   :  { %v758_v15 = vld [vmem:[#allocation5 + $0x44] sm:$0xf0]  ;;  %v671_v16 = vor.u32 %v761_v10, %v668_v11  ;;  %v759_v17 = vld [vmem:[#allocation5 + $0x54] sm:$0xf]  ;;  %v660_v18 = vld [vmem:[#allocation5 + $0x58] sm:$0xf0] }
  0x1c   :  { %227 = vmatpush.bf16.msra.mxu1 %v679_v13  ;;  %v651_v19 = vor.u32 %v758_v15, %v650_v14  ;;  %v642_v20 = vld [vmem:[#allocation5 + $0x30] sm:$0xf]  ;;  %v756_v21 = vld [vmem:[#allocation5 + $0x34] sm:$0xf0]  ;;  %v663_v22 = vor.u32 %v759_v17, %v660_v18  ;;  %v757_v23 = vld [vmem:[#allocation5 + $0x44] sm:$0xf] }
  0x1d   :  { %v652_v24 = vld [vmem:[#allocation5 + $0x48] sm:$0xf0]  ;;  %v643_v25 = vor.u32 %v756_v21, %v642_v20  ;;  %v634_v26 = vld [vmem:[#allocation5 + $0x20] sm:$0xf]  ;;  %v754_v27 = vld [vmem:[#allocation5 + $0x24] sm:$0xf0] }
  0x1e   :  { %214 = vmatpush.bf16.msra.mxu0 %v667_v5  ;;  %v655_v28 = vor.u32 %v757_v23, %v652_v24  ;;  %v755_v29 = vld [vmem:[#allocation5 + $0x34] sm:$0xf]  ;;  %v644_v30 = vld [vmem:[#allocation5 + $0x38] sm:$0xf0]  ;;  %v635_v31 = vor.u32 %v754_v27, %v634_v26  ;;  %v626_v32 = vld [vmem:[#allocation5 + $0x10] sm:$0xf] }
  0x1f   :  { %v752_v33 = vld [vmem:[#allocation5 + $0x14] sm:$0xf0]  ;;  %v647_v34 = vor.u32 %v755_v29, %v644_v30  ;;  %v753_v35 = vld [vmem:[#allocation5 + $0x24] sm:$0xf]  ;;  %v636_v36 = vld [vmem:[#allocation5 + $0x28] sm:$0xf0] }
  0x20   :  { %228 = vmatpush.bf16.msra.mxu1 %v671_v16  ;;  %v627_v37 = vor.u32 %v752_v33, %v626_v32  ;;  %v618_v38 = vld [vmem:[#allocation5] sm:$0xf]  ;;  %v750_v39 = vld [vmem:[#allocation5 + $0x4] sm:$0xf0]  ;;  %v639_v40 = vor.u32 %v753_v35, %v636_v36  ;;  %v751_v41 = vld [vmem:[#allocation5 + $0x14] sm:$0xf] }
  0x21   :  { %v628_v42 = vld [vmem:[#allocation5 + $0x18] sm:$0xf0]  ;;  %v619_v43 = vor.u32 %v750_v39, %v618_v38  ;;  %v749_v46 = vld [vmem:[#allocation5 + $0x4] sm:$0xf]  ;;  %v620_v47 = vld [vmem:[#allocation5 + $0x8] sm:$0xf0] }
  0x22   :  { %215 = vmatpush.bf16.msra.mxu0 %v659_v12  ;;  %v631_v44 = vor.u32 %v751_v41, %v628_v42  ;;  %v748_v45 = vld [vmem:[#allocation2] sm:$0xff]  ;;  %v623_v48 = vor.u32 %v749_v46, %v620_v47  ;;  %v1032_v49 = vld [vmem:[#allocation7] sm:$0x3]  ;;  %v770_v0 = vld [vmem:[#allocation8 + $0x28] sm:$0xff]  ;;  %s967_s28 = smov [#allocation11]   ;;  %s597_s9 = sshll.u32 %s1099_s7, 4  ;;  %s598_s9 = int_to_ptr.hbm [resolvable:$true] %s597_s9 }
  0x23   :  { %v123_v50 = vperm.slane %v1032_v49, 0  ;;  %v772_v54 = vld [vmem:[#allocation8 + $0x38] sm:$0xff]  ;;  %v771_v57 = vld [vmem:[#allocation8 + $0x30] sm:$0xff]  ;;  %v769_v6 = vld [vmem:[#allocation8 + $0x20] sm:$0xff]  ;;  %s595_s29 = sshll.u32 %s967_s28, 4  ;;  %s596_s29 = int_to_ptr.vmem [resolvable:$true] %s595_s29 }
  0x24   :  { %229 = vmatpush.bf16.msra.mxu1 %v663_v22  ;;  %400 = vmatpush.bf16.msra.mxu2 %v772_v54  ;;  %v768_v13 = vld [vmem:[#allocation8 + $0x18] sm:$0xff]  ;;  %v767_v21 = vld [vmem:[#allocation8 + $0x10] sm:$0xff]  ;;  %v765_v33 = vld [vmem:[#allocation8] sm:$0xff] }
  0x26   :  { %216 = vmatpush.bf16.msra.mxu0 %v651_v19 }
  0x28   :  { %230 = vmatpush.bf16.msra.mxu1 %v655_v28  ;;  %401 = vmatpush.bf16.msra.mxu2 %v771_v57  ;;  %v766_v28 = vld [vmem:[#allocation8 + $0x8] sm:$0xff] }
  0x2a   :  { %217 = vmatpush.bf16.msra.mxu0 %v643_v25 }
  0x2c   :  { %231 = vmatpush.bf16.msra.mxu1 %v647_v34  ;;  %402 = vmatpush.bf16.msra.mxu2 %v770_v0 }
  0x2e   :  { %218 = vmatpush.bf16.msra.mxu0 %v635_v31 }
  0x30   :  { %232 = vmatpush.bf16.msra.mxu1 %v639_v40  ;;  %403 = vmatpush.bf16.msra.mxu2 %v769_v6 }
  0x32   :  { %219 = vmatpush.bf16.msra.mxu0 %v627_v37 }
  0x34   :  { %233 = vmatpush.bf16.msra.mxu1 %v631_v44  ;;  %404 = vmatpush.bf16.msra.mxu2 %v768_v13 }
  0x36   :  { %220 = vmatpush.bf16.msra.mxu0 %v619_v43 }
  0x38   :  { %234 = vmatpush.bf16.msra.mxu1 %v623_v48  ;;  %405 = vmatpush.bf16.msra.mxu2 %v767_v21 }
  0x39   :  { %221 = vmatmul.bf16.vlgmr.msra.gmra.mxu0 %v748_v45 }
  0x3b   :  { %235 = vmatmul.bf16.vlgmr.msra.gmra.mxu1 %v748_v45 }
  0x3c   :  { %406 = vmatpush.bf16.msra.mxu2 %v766_v28  ;;  %v779_v28 = vld [vmem:[#allocation10 + $0x30] sm:$0xff] }
  0x40   :  { %407 = vmatpush.bf16.msra.mxu2 %v765_v33 }
  0xb6   :  { %v222_v51 = vpop.f32.mrf.mxu0 }
  0xb7   :  { %v1035_v52 = vadd.f32 %v222_v51, %v123_v50 }
  0xb8   :  { %v236_v0 = vpop.f32.mrf.mxu1 }
  0xb9   :  { %v1038_v53 = vmul.f32 0.70710677, %v1035_v52  ;;  %v241_v13 = vmul.f32 0.5, %v1035_v52 }
  0xbb   :  { %v245_v55 = vmul.f32 %v1038_v53, %v1038_v53 }
  0xbd   :  { %v246_v56 = vmin.f32 %v245_v55, 16.0 }
  0xbe   :  { %v224_v58 = vpop.f32.mrf.mxu0 }
  0xbf   :  { %v247_v59 = vmul.f32 2.1237322e-06, %v246_v56  ;;  %v258_v60 = vmul.f32 3.8918573e-05, %v246_v56  ;;  %v1042_v61 = vadd.f32 %v224_v58, %v123_v50 }
  0xc1   :  { %v248_v62 = vadd.f32 0.00028619796, %v247_v59  ;;  %v259_v63 = vadd.f32 0.001143296, %v258_v60  ;;  %v1045_v1 = vmul.f32 0.70710677, %v1042_v61 }
  0xc3   :  { %v249_v2 = vmul.f32 %v248_v62, %v246_v56  ;;  %v260_v3 = vmul.f32 %v259_v63, %v246_v56  ;;  %v285_v4 = vmul.f32 %v1045_v1, %v1045_v1 }
  0xc5   :  { %v261_v5 = vadd.f32 0.014752088, %v260_v3  ;;  %v286_v7 = vmin.f32 %v285_v4, 16.0  ;;  %v250_v8 = vadd.f32 0.0036580483, %v249_v2 }
  0xc7   :  { %v262_v9 = vmul.f32 %v261_v5, %v246_v56  ;;  %v287_v10 = vmul.f32 2.1237322e-06, %v286_v7  ;;  %v298_v11 = vmul.f32 3.8918573e-05, %v286_v7  ;;  %v251_v16 = vmul.f32 %v250_v8, %v246_v56 }
  0xc9   :  { %v263_v12 = vadd.f32 0.112945676, %v262_v9  ;;  %v288_v14 = vadd.f32 0.00028619796, %v287_v10  ;;  %v299_v15 = vadd.f32 0.001143296, %v298_v11 }
  0xca   :  { %v252_v23 = vadd.f32 0.05243302, %v251_v16  ;;  %v124_v11 = vperm.slane %v1032_v49, 1  ;;  %v242_v16 = vmul.f32 0.5, %v1042_v61  ;;  %v796_v49 = vld [vmem:[%s1096_s4] ss:$0 sm:$0xff] }
  0xcb   :  { %v264_v17 = vmul.f32 %v263_v12, %v246_v56  ;;  %v289_v18 = vmul.f32 %v288_v14, %v286_v7  ;;  %v300_v19 = vmul.f32 %v299_v15, %v286_v7  ;;  %v238_v15 = vpop.f32.mrf.mxu1 }
  0xcc   :  { %v253_v30 = vmul.f32 %v252_v23, %v246_v56 }
  0xcd   :  { %v265_v20 = vadd.f32 0.4994258, %v264_v17  ;;  %v301_v22 = vadd.f32 0.014752088, %v300_v19  ;;  %v290_v25 = vadd.f32 0.0036580483, %v289_v18  ;;  %v237_v17 = vadd.f32 %v236_v0, %v124_v11 }
  0xce   :  { %v254_v35 = vadd.f32 0.18741608, %v253_v30 }
  0xcf   :  { %v266_v24 = vmul.f32 %v265_v20, %v246_v56  ;;  %v302_v26 = vmul.f32 %v301_v22, %v286_v7  ;;  %v291_v31 = vmul.f32 %v290_v25, %v286_v7  ;;  %v239_v20 = vadd.f32 %v238_v15, %v124_v11  ;;  %v780_v25 = vld [vmem:[#allocation10 + $0x38] sm:$0xff] }
  0xd0   :  { %v255_v41 = vmul.f32 %v254_v35, %v246_v56  ;;  %573 = vmatpush.bf16.msra.mxu3 %v780_v25  ;;  %v778_v35 = vld [vmem:[#allocation10 + $0x28] sm:$0xff] }
  0xd1   :  { %v267_v27 = vadd.f32 1.0, %v266_v24  ;;  %v303_v29 = vadd.f32 0.112945676, %v302_v26  ;;  %v292_v36 = vadd.f32 0.05243302, %v291_v31 }
  0xd2   :  { %v256_v47 = vadd.f32 1.1283791, %v255_v41  ;;  %v777_v41 = vld [vmem:[#allocation10 + $0x20] sm:$0xff] }
  0xd3   :  { %798 = vrcp.f32 %v267_v27  ;;  %v304_v32 = vmul.f32 %v303_v29, %v286_v7  ;;  %v293_v42 = vmul.f32 %v292_v36, %v286_v7  ;;  %v279_v44 = vand.u32 2147483648, %v267_v27 }
  0xd4   :  { %v277_v46 = vand.u32 2147483647, %v267_v27  ;;  %vm273_vm1 = vweird.f32 %v267_v27  ;;  %v257_v57 = vmul.f32 %v256_v47, %v1038_v53  ;;  %574 = vmatpush.bf16.msra.mxu3 %v779_v28 }
  0xd5   :  { %v305_v34 = vadd.f32 0.4994258, %v304_v32  ;;  %v294_v48 = vadd.f32 0.18741608, %v293_v42  ;;  %v280_v51 = vor.u32 1.1754944e-38, %v279_v44 }
  0xd6   :  { %vm278_vm3 = vcmp.eq.f32.partialorder %v277_v46, 8.507059e+37 }
  0xd7   :  { %v306_v37 = vmul.f32 %v305_v34, %v286_v7  ;;  %v295_v56 = vmul.f32 %v294_v48, %v286_v7  ;;  %v776_v48 = vld [vmem:[#allocation10 + $0x18] sm:$0xff] }
  0xd8   :  { %575 = vmatpush.bf16.msra.mxu3 %v778_v35 }
  0xd9   :  { %v799_v38 = vpop.eup %798  ;;  %v307_v40 = vadd.f32 1.0, %v306_v37  ;;  %v296_v2 = vadd.f32 1.1283791, %v295_v56 }
  0xda   :  { %v269_v39 = vmul.f32 %v799_v38, %v267_v27  ;;  %vm274_vm0 = vweird.f32 %v799_v38 }
  0xdb   :  { %800 = vrcp.f32 %v307_v40  ;;  %vm275_vm2 = vmor %vm273_vm1, %vm274_vm0  ;;  %v319_v63 = vand.u32 2147483648, %v307_v40  ;;  %v317_v4 = vand.u32 2147483647, %v307_v40  ;;  %vm313_vm5 = vweird.f32 %v307_v40 }
  0xdc   :  { %v270_v43 = vsub.f32 1.0, %v269_v39  ;;  %v297_v9 = vmul.f32 %v296_v2, %v1045_v1  ;;  %576 = vmatpush.bf16.msra.mxu3 %v777_v41 }
  0xdd   :  { %v320_v8 = vor.u32 1.1754944e-38, %v319_v63  ;;  %vm318_vm7 = vcmp.eq.f32.partialorder %v317_v4, 8.507059e+37  ;;  %v774_v4 = vld [vmem:[#allocation10 + $0x8] sm:$0xff] }
  0xde   :  { %v271_v45 = vmul.f32 %v799_v38, %v270_v43 }
  0xe0   :  { %v272_v50 = vadd.f32 %v799_v38, %v271_v45  ;;  %577 = vmatpush.bf16.msra.mxu3 %v776_v48 }
  0xe1   :  { %v801_v54 = vpop.eup %800 }
  0xe2   :  { %v276_v55 = vsel %vm275_vm2, %v799_v38, %v272_v50  ;;  %v309_v59 = vmul.f32 %v801_v54, %v307_v40  ;;  %vm314_vm4 = vweird.f32 %v801_v54 }
  0xe3   :  { %v281_v58 = vsel %vm278_vm3, %v280_v51, %v276_v55  ;;  %vm315_vm6 = vmor %vm313_vm5, %vm314_vm4 }
  0xe4   :  { %v282_v60 = vmul.f32 %v281_v58, %v257_v57  ;;  %v310_v62 = vsub.f32 1.0, %v309_v59  ;;  %v775_v59 = vld [vmem:[#allocation10 + $0x10] sm:$0xff] }
  0xe5   :  { %578 = vmatpush.bf16.msra.mxu3 %v775_v59  ;;  %v797_v59 = vld [vmem:[%s1098_s6] ss:$0 sm:$0xff] }
  0xe6   :  { %v311_v3 = vmul.f32 %v801_v54, %v310_v62  ;;  %v680_v6 = vclamps-f32 %v282_v60, 1.0 }
  0xe8   :  { %v312_v5 = vadd.f32 %v801_v54, %v311_v3  ;;  %v325_v12 = vadd.f32 1.0, %v680_v6 }
  0xe9   :  { %579 = vmatpush.bf16.msra.mxu3 %v774_v4 }
  0xea   :  { %v316_v10 = vsel %vm315_vm6, %v801_v54, %v312_v5  ;;  %v327_v18 = vmul.f32 %v325_v12, %v241_v13 }
  0xeb   :  { %v321_v53 = vsel %vm318_vm7, %v320_v8, %v316_v10 }
  0xec   :  { %v322_v7 = vmul.f32 %v321_v53, %v297_v9  ;;  %v1054_v22 = vadd.f32 %v327_v18, %v237_v17  ;;  %v773_v9 = vld [vmem:[#allocation10] sm:$0xff] }
  0xed   :  { %580 = vmatpush.bf16.msra.mxu3 %v773_v9 }
  0xee   :  { %v681_v14 = vclamps-f32 %v322_v7, 1.0 }
  0xf0   :  { %v326_v19 = vadd.f32 1.0, %v681_v14 }
  0xf2   :  { %v328_v21 = vmul.f32 %v326_v19, %v242_v16 }
  0xf4   :  { %v1056_v1 = vadd.f32 %v328_v21, %v239_v20 }
  0xf6   :  { %v331_v23 = vpack.c.bf16 %v1056_v1, %v1054_v22 }
  0xf8   :  { %408 = vmatmul.bf16.vlgmr.msra.gmra.mxu2 %v331_v23 }
 0x17b   :  { %v409_v52 = vpop.f32.mrf.mxu2 }
 0x17c   :  { %v1063_v24 = vadd.f32 %v796_v49, %v409_v52 }
 0x17e   :  { %v1066_v61 = vmul.f32 0.70710677, %v1063_v24 }
 0x180   :  { %v418_v26 = vmul.f32 %v1066_v61, %v1066_v61 }
 0x182   :  { %v419_v27 = vmin.f32 %v418_v26, 16.0 }
 0x183   :  { %v411_v29 = vpop.f32.mrf.mxu2 }
 0x184   :  { %v420_v30 = vmul.f32 2.1237322e-06, %v419_v27  ;;  %v431_v31 = vmul.f32 3.8918573e-05, %v419_v27  ;;  %v1070_v32 = vadd.f32 %v796_v49, %v411_v29 }
 0x186   :  { %v421_v33 = vadd.f32 0.00028619796, %v420_v30  ;;  %v432_v34 = vadd.f32 0.001143296, %v431_v31  ;;  %v1073_v36 = vmul.f32 0.70710677, %v1070_v32 }
 0x188   :  { %v422_v37 = vmul.f32 %v421_v33, %v419_v27  ;;  %v433_v38 = vmul.f32 %v432_v34, %v419_v27  ;;  %v458_v39 = vmul.f32 %v1073_v36, %v1073_v36 }
 0x18a   :  { %v434_v40 = vadd.f32 0.014752088, %v433_v38  ;;  %v459_v42 = vmin.f32 %v458_v39, 16.0  ;;  %v423_v43 = vadd.f32 0.0036580483, %v422_v37 }
 0x18c   :  { %v435_v44 = vmul.f32 %v434_v40, %v419_v27  ;;  %v460_v45 = vmul.f32 2.1237322e-06, %v459_v42  ;;  %v471_v46 = vmul.f32 3.8918573e-05, %v459_v42  ;;  %v424_v54 = vmul.f32 %v423_v43, %v419_v27 }
 0x18e   :  { %v436_v47 = vadd.f32 0.112945676, %v435_v44  ;;  %v461_v50 = vadd.f32 0.00028619796, %v460_v45  ;;  %v472_v51 = vadd.f32 0.001143296, %v471_v46 }
 0x18f   :  { %v425_v62 = vadd.f32 0.05243302, %v424_v54 }
 0x190   :  { %v437_v55 = vmul.f32 %v436_v47, %v419_v27  ;;  %v462_v57 = vmul.f32 %v461_v50, %v459_v42  ;;  %v473_v58 = vmul.f32 %v472_v51, %v459_v42  ;;  %v414_v47 = vmul.f32 0.5, %v1063_v24 }
 0x191   :  { %v426_v6 = vmul.f32 %v425_v62, %v419_v27  ;;  %v415_v51 = vmul.f32 0.5, %v1070_v32 }
 0x192   :  { %v438_v56 = vadd.f32 0.4994258, %v437_v55  ;;  %v474_v60 = vadd.f32 0.014752088, %v473_v58  ;;  %v463_v0 = vadd.f32 0.0036580483, %v462_v57 }
 0x193   :  { %v427_v7 = vadd.f32 0.18741608, %v426_v6 }
 0x194   :  { %v439_v63 = vmul.f32 %v438_v56, %v419_v27  ;;  %v475_v2 = vmul.f32 %v474_v60, %v459_v42  ;;  %v464_v8 = vmul.f32 %v463_v0, %v459_v42 }
 0x195   :  { %v428_v16 = vmul.f32 %v427_v7, %v419_v27 }
 0x196   :  { %v440_v3 = vadd.f32 1.0, %v439_v63  ;;  %v476_v5 = vadd.f32 0.112945676, %v475_v2  ;;  %v465_v11 = vadd.f32 0.05243302, %v464_v8 }
 0x197   :  { %v429_v23 = vadd.f32 1.1283791, %v428_v16 }
 0x198   :  { %802 = vrcp.f32 %v440_v3  ;;  %v477_v10 = vmul.f32 %v476_v5, %v459_v42  ;;  %v466_v17 = vmul.f32 %v465_v11, %v459_v42  ;;  %v452_v19 = vand.u32 2147483648, %v440_v3 }
 0x199   :  { %v450_v21 = vand.u32 2147483647, %v440_v3  ;;  %vm446_vm9 = vweird.f32 %v440_v3  ;;  %v430_v29 = vmul.f32 %v429_v23, %v1066_v61 }
 0x19a   :  { %v478_v53 = vadd.f32 0.4994258, %v477_v10  ;;  %v467_v49 = vadd.f32 0.18741608, %v466_v17  ;;  %v453_v25 = vor.u32 1.1754944e-38, %v452_v19 }
 0x19b   :  { %vm451_vm11 = vcmp.eq.f32.partialorder %v450_v21, 8.507059e+37 }
 0x19c   :  { %v479_v12 = vmul.f32 %v478_v53, %v459_v42  ;;  %v468_v27 = vmul.f32 %v467_v49, %v459_v42 }
 0x19e   :  { %v803_v13 = vpop.eup %802  ;;  %v480_v15 = vadd.f32 1.0, %v479_v12  ;;  %v469_v37 = vadd.f32 1.1283791, %v468_v27 }
 0x19f   :  { %v442_v14 = vmul.f32 %v803_v13, %v440_v3  ;;  %vm447_vm8 = vweird.f32 %v803_v13 }
 0x1a0   :  { %804 = vrcp.f32 %v480_v15  ;;  %vm448_vm10 = vmor %vm446_vm9, %vm447_vm8  ;;  %v492_v35 = vand.u32 2147483648, %v480_v15  ;;  %v490_v39 = vand.u32 2147483647, %v480_v15  ;;  %vm486_vm13 = vweird.f32 %v480_v15 }
 0x1a1   :  { %v443_v18 = vsub.f32 1.0, %v442_v14  ;;  %v470_v44 = vmul.f32 %v469_v37, %v1073_v36 }
 0x1a2   :  { %v493_v43 = vor.u32 1.1754944e-38, %v492_v35  ;;  %vm491_vm15 = vcmp.eq.f32.partialorder %v490_v39, 8.507059e+37 }
 0x1a3   :  { %v444_v20 = vmul.f32 %v803_v13, %v443_v18 }
 0x1a5   :  { %v445_v52 = vadd.f32 %v803_v13, %v444_v20 }
 0x1a6   :  { %v805_v26 = vpop.eup %804 }
 0x1a7   :  { %v449_v28 = vsel %vm448_vm10, %v803_v13, %v445_v52  ;;  %v482_v31 = vmul.f32 %v805_v26, %v480_v15  ;;  %vm487_vm12 = vweird.f32 %v805_v26 }
 0x1a8   :  { %v454_v30 = vsel %vm451_vm11, %v453_v25, %v449_v28  ;;  %vm488_vm14 = vmor %vm486_vm13, %vm487_vm12 }
 0x1a9   :  { %v455_v33 = vmul.f32 %v454_v30, %v430_v29  ;;  %v483_v34 = vsub.f32 1.0, %v482_v31 }
 0x1ab   :  { %v484_v38 = vmul.f32 %v805_v26, %v483_v34  ;;  %v714_v40 = vclamps-f32 %v455_v33, 1.0 }
 0x1ad   :  { %v485_v41 = vadd.f32 %v805_v26, %v484_v38  ;;  %v498_v46 = vadd.f32 1.0, %v714_v40 }
 0x1af   :  { %v489_v45 = vsel %vm488_vm14, %v805_v26, %v485_v41  ;;  %v500_v50 = vmul.f32 %v498_v46, %v414_v47 }
 0x1b0   :  { %v494_v61 = vsel %vm491_vm15, %v493_v43, %v489_v45 }
 0x1b1   :  { %v495_v42 = vmul.f32 %v494_v61, %v470_v44  ;;  %v502_v57 = vadd.f32 %v500_v50, %v1054_v22 }
 0x1b3   :  { %v715_v48 = vclamps-f32 %v495_v42, 1.0 }
 0x1b5   :  { %v499_v54 = vadd.f32 1.0, %v715_v48 }
 0x1b7   :  { %v501_v55 = vmul.f32 %v499_v54, %v415_v51 }
 0x1b9   :  { %v503_v58 = vadd.f32 %v501_v55, %v1056_v1 }
 0x1bb   :  { %v504_v56 = vpack.c.bf16 %v503_v58, %v502_v57 }
 0x1bd   :  { %581 = vmatmul.bf16.vlgmr.msra.gmra.mxu3 %v504_v56 }
 0x240   :  { %v582_v36 = vpop.f32.mrf.mxu3 }
 0x241   :  { %v583_v24 = vadd.f32 %v797_v59, %v582_v36 }
 0x248   :  { %v584_v60 = vpop.f32.mrf.mxu3 }
 0x249   :  { %v585_v32 = vadd.f32 %v797_v59, %v584_v60 }
 0x24b   :  { %v784_v62 = vpack.c.bf16 %v585_v32, %v583_v24 }
 0x24d   :  { %785 = vst [vmem:[#allocation11] sm:$0xff] %v784_v62  }
 0x24e   :  { %603 = dma.vmem_to_hbm [thread:$0]  %s596_s29, 128, %s598_s9, [#allocation4], %s962_s1, %s962_s1, %s963_s16  }
 0x24f   :  { %956 = dma.done.wait [#allocation4], 128  }
 0x250   :  { %957 = vsyncadd [#allocation4], 4294967168 }
 0x251   :  { %608 = vsyncpa [#allocation3], 1 }
 0x252   :  { %609 = vsyncpa [#allocation6], 1 }
 0x253   :  { %610 = vsyncpa [#allocation9], 1 }
 0x254   :  { %611 = vsyncpa [#allocation4], 1 }

// kernel: tpu_custom_call.1
= control target key start
LH: loop header
LB: loop body
LE: loop exit
PB: predicated region body
PF: predicated region fallthrough
CT: control target
= control target key end

     0   :  { %12 = vsyncpa [#allocation3], 0  ;;  %s1092_s0 = inlined_call_operand.hbm [shape: bf16[16,128], index: 0, kind: input, shape index: {}]   ;;  %s1093_s1 = inlined_call_operand.hbm [shape: bf16[128,256], index: 1, kind: input, shape index: {}]   ;;  %s1094_s2 = inlined_call_operand.hbm [shape: f32[1,256], index: 2, kind: input, shape index: {}]   ;;  %s1095_s3 = inlined_call_operand.hbm [shape: bf16[128,128], index: 3, kind: input, shape index: {}]   ;;  %s1096_s4 = inlined_call_operand.vmem [shape: f32[1,128], index: 4, kind: input, shape index: {}]   ;;  %s1097_s5 = inlined_call_operand.hbm [shape: bf16[128,128], index: 5, kind: input, shape index: {}]   ;;  %s1098_s6 = inlined_call_operand.vmem [shape: f32[1,128], index: 6, kind: input, shape index: {}]   ;;  %s1099_s7 = inlined_call_operand.hbm [shape: bf16[16,128], index: 7, kind: output, shape index: {}]  }
   0x1   :  { %13 = vsyncpa [#allocation6], 0 }
   0x2   :  { %14 = vsyncpa [#allocation9], 0  ;;  %s33_s26 = sshll.u32 %s1093_s1, 4  ;;  %s34_s26 = int_to_ptr.hbm [resolvable:$true] %s33_s26 }
   0x3   :  { %15 = vsyncpa [#allocation4], 0  ;;  %s958_s27 = smov [#allocation5]   ;;  %s959_s29 = smov 128  }
   0x4   :  { %s35_s28 = sshll.u32 %s958_s27, 4  ;;  %s960_s30 = smov 8   ;;  %s36_s28 = int_to_ptr.vmem [resolvable:$true] %s35_s28 }
   0x5   :  { %41 = dma.hbm_to_vmem [thread:$0]  %s34_s26, 2048, %s36_s28, [#allocation6], %s959_s29, %s959_s29, %s960_s30  }
   0x6   :  { %s57_s10 = sshll.u32 %s1095_s3, 4  ;;  %s961_s11 = smov [#allocation8]   ;;  %s58_s10 = int_to_ptr.hbm [resolvable:$true] %s57_s10 }
   0x7   :  { %s59_s12 = sshll.u32 %s961_s11, 4  ;;  %s20_s15 = sshll.u32 %s1092_s0, 4  ;;  %s60_s12 = int_to_ptr.vmem [resolvable:$true] %s59_s12  ;;  %s21_s15 = int_to_ptr.hbm [resolvable:$true] %s20_s15 }
   0x8   :  { %s962_s1 = smov 64   ;;  %s963_s16 = smov 4  }
   0x9   :  { %65 = dma.hbm_to_vmem [thread:$0]  %s58_s10, 1024, %s60_s12, [#allocation9], %s962_s1, %s962_s1, %s963_s16  }
   0xa   :  { %s47_s19 = sshll.u32 %s1094_s2, 4  ;;  %s964_s3 = smov [#allocation2]   ;;  %s48_s19 = int_to_ptr.hbm [resolvable:$true] %s47_s19 }
   0xb   :  { %s22_s20 = sshll.u32 %s964_s3, 4  ;;  %s965_s0 = smov [#allocation7]   ;;  %s23_s20 = int_to_ptr.vmem [resolvable:$true] %s22_s20 }
   0xc   :  { %28 = dma.hbm_to_vmem [thread:$0]  %s21_s15, 128, %s23_s20, [#allocation3], %s962_s1, %s962_s1, %s963_s16  }
   0xd   :  { %s49_s21 = sshll.u32 %s965_s0, 4  ;;  %s72_s24 = sshll.u32 %s1097_s5, 4  ;;  %s50_s21 = int_to_ptr.vmem [resolvable:$true] %s49_s21  ;;  %s73_s24 = int_to_ptr.hbm [resolvable:$true] %s72_s24 }
   0xe   :  { %52 = dma.hbm_to_vmem [thread:$0]  %s48_s19, 32, %s50_s21, [#allocation6]  }
   0xf   :  { %s966_s25 = smov [#allocation10]  }
  0x10   :  { %s74_s26 = sshll.u32 %s966_s25, 4  ;;  %s75_s26 = int_to_ptr.vmem [resolvable:$true] %s74_s26 }
  0x11   :  { %80 = dma.hbm_to_vmem [thread:$0]  %s73_s24, 1024, %s75_s26, [#allocation9], %s962_s1, %s962_s1, %s963_s16  }
  0x12   :  { %950 = dma.done.wait [#allocation3], 128  }
  0x13   :  { %951 = vsyncadd [#allocation3], 4294967168 }
  0x14   :  { %952 = dma.done.wait [#allocation6], 2080  }
  0x15   :  { %953 = vsyncadd [#allocation6], 4294965216 }
  0x16   :  { %954 = dma.done.wait [#allocation9], 2048  }
  0x17   :  { %955 = vsyncadd [#allocation9], 4294965248  ;;  %v674_v0 = vld [vmem:[#allocation5 + $0x70] sm:$0xf]  ;;  %v764_v1 = vld [vmem:[#allocation5 + $0x74] sm:$0xf0] }
  0x18   :  { %v666_v2 = vld [vmem:[#allocation5 + $0x60] sm:$0xf]  ;;  %v675_v3 = vor.u32 %v764_v1, %v674_v0  ;;  %v762_v4 = vld [vmem:[#allocation5 + $0x64] sm:$0xf0]  ;;  %v658_v6 = vld [vmem:[#allocation5 + $0x50] sm:$0xf] }
  0x19   :  { %v667_v5 = vor.u32 %v762_v4, %v666_v2  ;;  %v760_v7 = vld [vmem:[#allocation5 + $0x54] sm:$0xf0]  ;;  %v763_v8 = vld [vmem:[#allocation5 + $0x74] sm:$0xf]  ;;  %v676_v9 = vld [vmem:[#allocation5 + $0x78] sm:$0xf0] }
  0x1a   :  { %213 = vmatpush.bf16.msra.mxu0 %v675_v3  ;;  %v761_v10 = vld [vmem:[#allocation5 + $0x64] sm:$0xf]  ;;  %v668_v11 = vld [vmem:[#allocation5 + $0x68] sm:$0xf0]  ;;  %v659_v12 = vor.u32 %v760_v7, %v658_v6  ;;  %v679_v13 = vor.u32 %v763_v8, %v676_v9  ;;  %v650_v14 = vld [vmem:[#allocation5 + $0x40] sm:$0xf] }
  0x1b   :  { %v758_v15 = vld [vmem:[#allocation5 + $0x44] sm:$0xf0]  ;;  %v671_v16 = vor.u32 %v761_v10, %v668_v11  ;;  %v759_v17 = vld [vmem:[#allocation5 + $0x54] sm:$0xf]  ;;  %v660_v18 = vld [vmem:[#allocation5 + $0x58] sm:$0xf0] }
  0x1c   :  { %227 = vmatpush.bf16.msra.mxu1 %v679_v13  ;;  %v651_v19 = vor.u32 %v758_v15, %v650_v14  ;;  %v642_v20 = vld [vmem:[#allocation5 + $0x30] sm:$0xf]  ;;  %v756_v21 = vld [vmem:[#allocation5 + $0x34] sm:$0xf0]  ;;  %v663_v22 = vor.u32 %v759_v17, %v660_v18  ;;  %v757_v23 = vld [vmem:[#allocation5 + $0x44] sm:$0xf] }
  0x1d   :  { %v652_v24 = vld [vmem:[#allocation5 + $0x48] sm:$0xf0]  ;;  %v643_v25 = vor.u32 %v756_v21, %v642_v20  ;;  %v634_v26 = vld [vmem:[#allocation5 + $0x20] sm:$0xf]  ;;  %v754_v27 = vld [vmem:[#allocation5 + $0x24] sm:$0xf0] }
  0x1e   :  { %214 = vmatpush.bf16.msra.mxu0 %v667_v5  ;;  %v655_v28 = vor.u32 %v757_v23, %v652_v24  ;;  %v755_v29 = vld [vmem:[#allocation5 + $0x34] sm:$0xf]  ;;  %v644_v30 = vld [vmem:[#allocation5 + $0x38] sm:$0xf0]  ;;  %v635_v31 = vor.u32 %v754_v27, %v634_v26  ;;  %v626_v32 = vld [vmem:[#allocation5 + $0x10] sm:$0xf] }
  0x1f   :  { %v752_v33 = vld [vmem:[#allocation5 + $0x14] sm:$0xf0]  ;;  %v647_v34 = vor.u32 %v755_v29, %v644_v30  ;;  %v753_v35 = vld [vmem:[#allocation5 + $0x24] sm:$0xf]  ;;  %v636_v36 = vld [vmem:[#allocation5 + $0x28] sm:$0xf0] }
  0x20   :  { %228 = vmatpush.bf16.msra.mxu1 %v671_v16  ;;  %v627_v37 = vor.u32 %v752_v33, %v626_v32  ;;  %v618_v38 = vld [vmem:[#allocation5] sm:$0xf]  ;;  %v750_v39 = vld [vmem:[#allocation5 + $0x4] sm:$0xf0]  ;;  %v639_v40 = vor.u32 %v753_v35, %v636_v36  ;;  %v751_v41 = vld [vmem:[#allocation5 + $0x14] sm:$0xf] }
  0x21   :  { %v628_v42 = vld [vmem:[#allocation5 + $0x18] sm:$0xf0]  ;;  %v619_v43 = vor.u32 %v750_v39, %v618_v38  ;;  %v749_v46 = vld [vmem:[#allocation5 + $0x4] sm:$0xf]  ;;  %v620_v47 = vld [vmem:[#allocation5 + $0x8] sm:$0xf0] }
  0x22   :  { %215 = vmatpush.bf16.msra.mxu0 %v659_v12  ;;  %v631_v44 = vor.u32 %v751_v41, %v628_v42  ;;  %v748_v45 = vld [vmem:[#allocation2] sm:$0xff]  ;;  %v623_v48 = vor.u32 %v749_v46, %v620_v47  ;;  %v1032_v49 = vld [vmem:[#allocation7] sm:$0x3]  ;;  %v770_v0 = vld [vmem:[#allocation8 + $0x28] sm:$0xff]  ;;  %s967_s28 = smov [#allocation11]   ;;  %s597_s9 = sshll.u32 %s1099_s7, 4  ;;  %s598_s9 = int_to_ptr.hbm [resolvable:$true] %s597_s9 }
  0x23   :  { %v123_v50 = vperm.slane %v1032_v49, 0  ;;  %v772_v54 = vld [vmem:[#allocation8 + $0x38] sm:$0xff]  ;;  %v771_v57 = vld [vmem:[#allocation8 + $0x30] sm:$0xff]  ;;  %v769_v6 = vld [vmem:[#allocation8 + $0x20] sm:$0xff]  ;;  %s595_s29 = sshll.u32 %s967_s28, 4  ;;  %s596_s29 = int_to_ptr.vmem [resolvable:$true] %s595_s29 }
  0x24   :  { %229 = vmatpush.bf16.msra.mxu1 %v663_v22  ;;  %400 = vmatpush.bf16.msra.mxu2 %v772_v54  ;;  %v768_v13 = vld [vmem:[#allocation8 + $0x18] sm:$0xff]  ;;  %v767_v21 = vld [vmem:[#allocation8 + $0x10] sm:$0xff]  ;;  %v765_v33 = vld [vmem:[#allocation8] sm:$0xff] }
  0x26   :  { %216 = vmatpush.bf16.msra.mxu0 %v651_v19 }
  0x28   :  { %230 = vmatpush.bf16.msra.mxu1 %v655_v28  ;;  %401 = vmatpush.bf16.msra.mxu2 %v771_v57  ;;  %v766_v28 = vld [vmem:[#allocation8 + $0x8] sm:$0xff] }
  0x2a   :  { %217 = vmatpush.bf16.msra.mxu0 %v643_v25 }
  0x2c   :  { %231 = vmatpush.bf16.msra.mxu1 %v647_v34  ;;  %402 = vmatpush.bf16.msra.mxu2 %v770_v0 }
  0x2e   :  { %218 = vmatpush.bf16.msra.mxu0 %v635_v31 }
  0x30   :  { %232 = vmatpush.bf16.msra.mxu1 %v639_v40  ;;  %403 = vmatpush.bf16.msra.mxu2 %v769_v6 }
  0x32   :  { %219 = vmatpush.bf16.msra.mxu0 %v627_v37 }
  0x34   :  { %233 = vmatpush.bf16.msra.mxu1 %v631_v44  ;;  %404 = vmatpush.bf16.msra.mxu2 %v768_v13 }
  0x36   :  { %220 = vmatpush.bf16.msra.mxu0 %v619_v43 }
  0x38   :  { %234 = vmatpush.bf16.msra.mxu1 %v623_v48  ;;  %405 = vmatpush.bf16.msra.mxu2 %v767_v21 }
  0x39   :  { %221 = vmatmul.bf16.vlgmr.msra.gmra.mxu0 %v748_v45 }
  0x3b   :  { %235 = vmatmul.bf16.vlgmr.msra.gmra.mxu1 %v748_v45 }
  0x3c   :  { %406 = vmatpush.bf16.msra.mxu2 %v766_v28  ;;  %v779_v28 = vld [vmem:[#allocation10 + $0x30] sm:$0xff] }
  0x40   :  { %407 = vmatpush.bf16.msra.mxu2 %v765_v33 }
  0xb6   :  { %v222_v51 = vpop.f32.mrf.mxu0 }
  0xb7   :  { %v1035_v52 = vadd.f32 %v222_v51, %v123_v50 }
  0xb8   :  { %v236_v0 = vpop.f32.mrf.mxu1 }
  0xb9   :  { %v1038_v53 = vmul.f32 0.70710677, %v1035_v52  ;;  %v241_v13 = vmul.f32 0.5, %v1035_v52 }
  0xbb   :  { %v245_v55 = vmul.f32 %v1038_v53, %v1038_v53 }
  0xbd   :  { %v246_v56 = vmin.f32 %v245_v55, 16.0 }
  0xbe   :  { %v224_v58 = vpop.f32.mrf.mxu0 }
  0xbf   :  { %v247_v59 = vmul.f32 2.1237322e-06, %v246_v56  ;;  %v258_v60 = vmul.f32 3.8918573e-05, %v246_v56  ;;  %v1042_v61 = vadd.f32 %v224_v58, %v123_v50 }
  0xc1   :  { %v248_v62 = vadd.f32 0.00028619796, %v247_v59  ;;  %v259_v63 = vadd.f32 0.001143296, %v258_v60  ;;  %v1045_v1 = vmul.f32 0.70710677, %v1042_v61 }
  0xc3   :  { %v249_v2 = vmul.f32 %v248_v62, %v246_v56  ;;  %v260_v3 = vmul.f32 %v259_v63, %v246_v56  ;;  %v285_v4 = vmul.f32 %v1045_v1, %v1045_v1 }
  0xc5   :  { %v261_v5 = vadd.f32 0.014752088, %v260_v3  ;;  %v286_v7 = vmin.f32 %v285_v4, 16.0  ;;  %v250_v8 = vadd.f32 0.0036580483, %v249_v2 }
  0xc7   :  { %v262_v9 = vmul.f32 %v261_v5, %v246_v56  ;;  %v287_v10 = vmul.f32 2.1237322e-06, %v286_v7  ;;  %v298_v11 = vmul.f32 3.8918573e-05, %v286_v7  ;;  %v251_v16 = vmul.f32 %v250_v8, %v246_v56 }
  0xc9   :  { %v263_v12 = vadd.f32 0.112945676, %v262_v9  ;;  %v288_v14 = vadd.f32 0.00028619796, %v287_v10  ;;  %v299_v15 = vadd.f32 0.001143296, %v298_v11 }
  0xca   :  { %v252_v23 = vadd.f32 0.05243302, %v251_v16  ;;  %v124_v11 = vperm.slane %v1032_v49, 1  ;;  %v242_v16 = vmul.f32 0.5, %v1042_v61  ;;  %v796_v49 = vld [vmem:[%s1096_s4] ss:$0 sm:$0xff] }
  0xcb   :  { %v264_v17 = vmul.f32 %v263_v12, %v246_v56  ;;  %v289_v18 = vmul.f32 %v288_v14, %v286_v7  ;;  %v300_v19 = vmul.f32 %v299_v15, %v286_v7  ;;  %v238_v15 = vpop.f32.mrf.mxu1 }
  0xcc   :  { %v253_v30 = vmul.f32 %v252_v23, %v246_v56 }
  0xcd   :  { %v265_v20 = vadd.f32 0.4994258, %v264_v17  ;;  %v301_v22 = vadd.f32 0.014752088, %v300_v19  ;;  %v290_v25 = vadd.f32 0.0036580483, %v289_v18  ;;  %v237_v17 = vadd.f32 %v236_v0, %v124_v11 }
  0xce   :  { %v254_v35 = vadd.f32 0.18741608, %v253_v30 }
  0xcf   :  { %v266_v24 = vmul.f32 %v265_v20, %v246_v56  ;;  %v302_v26 = vmul.f32 %v301_v22, %v286_v7  ;;  %v291_v31 = vmul.f32 %v290_v25, %v286_v7  ;;  %v239_v20 = vadd.f32 %v238_v15, %v124_v11  ;;  %v780_v25 = vld [vmem:[#allocation10 + $0x38] sm:$0xff] }
  0xd0   :  { %v255_v41 = vmul.f32 %v254_v35, %v246_v56  ;;  %573 = vmatpush.bf16.msra.mxu3 %v780_v25  ;;  %v778_v35 = vld [vmem:[#allocation10 + $0x28] sm:$0xff] }
  0xd1   :  { %v267_v27 = vadd.f32 1.0, %v266_v24  ;;  %v303_v29 = vadd.f32 0.112945676, %v302_v26  ;;  %v292_v36 = vadd.f32 0.05243302, %v291_v31 }
  0xd2   :  { %v256_v47 = vadd.f32 1.1283791, %v255_v41  ;;  %v777_v41 = vld [vmem:[#allocation10 + $0x20] sm:$0xff] }
  0xd3   :  { %798 = vrcp.f32 %v267_v27  ;;  %v304_v32 = vmul.f32 %v303_v29, %v286_v7  ;;  %v293_v42 = vmul.f32 %v292_v36, %v286_v7  ;;  %v279_v44 = vand.u32 2147483648, %v267_v27 }
  0xd4   :  { %v277_v46 = vand.u32 2147483647, %v267_v27  ;;  %vm273_vm1 = vweird.f32 %v267_v27  ;;  %v257_v57 = vmul.f32 %v256_v47, %v1038_v53  ;;  %574 = vmatpush.bf16.msra.mxu3 %v779_v28 }
  0xd5   :  { %v305_v34 = vadd.f32 0.4994258, %v304_v32  ;;  %v294_v48 = vadd.f32 0.18741608, %v293_v42  ;;  %v280_v51 = vor.u32 1.1754944e-38, %v279_v44 }
  0xd6   :  { %vm278_vm3 = vcmp.eq.f32.partialorder %v277_v46, 8.507059e+37 }
  0xd7   :  { %v306_v37 = vmul.f32 %v305_v34, %v286_v7  ;;  %v295_v56 = vmul.f32 %v294_v48, %v286_v7  ;;  %v776_v48 = vld [vmem:[#allocation10 + $0x18] sm:$0xff] }
  0xd8   :  { %575 = vmatpush.bf16.msra.mxu3 %v778_v35 }
  0xd9   :  { %v799_v38 = vpop.eup %798  ;;  %v307_v40 = vadd.f32 1.0, %v306_v37  ;;  %v296_v2 = vadd.f32 1.1283791, %v295_v56 }
  0xda   :  { %v269_v39 = vmul.f32 %v799_v38, %v267_v27  ;;  %vm274_vm0 = vweird.f32 %v799_v38 }
  0xdb   :  { %800 = vrcp.f32 %v307_v40  ;;  %vm275_vm2 = vmor %vm273_vm1, %vm274_vm0  ;;  %v319_v63 = vand.u32 2147483648, %v307_v40  ;;  %v317_v4 = vand.u32 2147483647, %v307_v40  ;;  %vm313_vm5 = vweird.f32 %v307_v40 }
  0xdc   :  { %v270_v43 = vsub.f32 1.0, %v269_v39  ;;  %v297_v9 = vmul.f32 %v296_v2, %v1045_v1  ;;  %576 = vmatpush.bf16.msra.mxu3 %v777_v41 }
  0xdd   :  { %v320_v8 = vor.u32 1.1754944e-38, %v319_v63  ;;  %vm318_vm7 = vcmp.eq.f32.partialorder %v317_v4, 8.507059e+37  ;;  %v774_v4 = vld [vmem:[#allocation10 + $0x8] sm:$0xff] }
  0xde   :  { %v271_v45 = vmul.f32 %v799_v38, %v270_v43 }
  0xe0   :  { %v272_v50 = vadd.f32 %v799_v38, %v271_v45  ;;  %577 = vmatpush.bf16.msra.mxu3 %v776_v48 }
  0xe1   :  { %v801_v54 = vpop.eup %800 }
  0xe2   :  { %v276_v55 = vsel %vm275_vm2, %v799_v38, %v272_v50  ;;  %v309_v59 = vmul.f32 %v801_v54, %v307_v40  ;;  %vm314_vm4 = vweird.f32 %v801_v54 }
  0xe3   :  { %v281_v58 = vsel %vm278_vm3, %v280_v51, %v276_v55  ;;  %vm315_vm6 = vmor %vm313_vm5, %vm314_vm4 }
  0xe4   :  { %v282_v60 = vmul.f32 %v281_v58, %v257_v57  ;;  %v310_v62 = vsub.f32 1.0, %v309_v59  ;;  %v775_v59 = vld [vmem:[#allocation10 + $0x10] sm:$0xff] }
  0xe5   :  { %578 = vmatpush.bf16.msra.mxu3 %v775_v59  ;;  %v797_v59 = vld [vmem:[%s1098_s6] ss:$0 sm:$0xff] }
  0xe6   :  { %v311_v3 = vmul.f32 %v801_v54, %v310_v62  ;;  %v680_v6 = vclamps-f32 %v282_v60, 1.0 }
  0xe8   :  { %v312_v5 = vadd.f32 %v801_v54, %v311_v3  ;;  %v325_v12 = vadd.f32 1.0, %v680_v6 }
  0xe9   :  { %579 = vmatpush.bf16.msra.mxu3 %v774_v4 }
  0xea   :  { %v316_v10 = vsel %vm315_vm6, %v801_v54, %v312_v5  ;;  %v327_v18 = vmul.f32 %v325_v12, %v241_v13 }
  0xeb   :  { %v321_v53 = vsel %vm318_vm7, %v320_v8, %v316_v10 }
  0xec   :  { %v322_v7 = vmul.f32 %v321_v53, %v297_v9  ;;  %v1054_v22 = vadd.f32 %v327_v18, %v237_v17  ;;  %v773_v9 = vld [vmem:[#allocation10] sm:$0xff] }
  0xed   :  { %580 = vmatpush.bf16.msra.mxu3 %v773_v9 }
  0xee   :  { %v681_v14 = vclamps-f32 %v322_v7, 1.0 }
  0xf0   :  { %v326_v19 = vadd.f32 1.0, %v681_v14 }
  0xf2   :  { %v328_v21 = vmul.f32 %v326_v19, %v242_v16 }
  0xf4   :  { %v1056_v1 = vadd.f32 %v328_v21, %v239_v20 }
  0xf6   :  { %v331_v23 = vpack.c.bf16 %v1056_v1, %v1054_v22 }
  0xf8   :  { %408 = vmatmul.bf16.vlgmr.msra.gmra.mxu2 %v331_v23 }
 0x17b   :  { %v409_v52 = vpop.f32.mrf.mxu2 }
 0x17c   :  { %v1063_v24 = vadd.f32 %v796_v49, %v409_v52 }
 0x17e   :  { %v1066_v61 = vmul.f32 0.70710677, %v1063_v24 }
 0x180   :  { %v418_v26 = vmul.f32 %v1066_v61, %v1066_v61 }
 0x182   :  { %v419_v27 = vmin.f32 %v418_v26, 16.0 }
 0x183   :  { %v411_v29 = vpop.f32.mrf.mxu2 }
 0x184   :  { %v420_v30 = vmul.f32 2.1237322e-06, %v419_v27  ;;  %v431_v31 = vmul.f32 3.8918573e-05, %v419_v27  ;;  %v1070_v32 = vadd.f32 %v796_v49, %v411_v29 }
 0x186   :  { %v421_v33 = vadd.f32 0.00028619796, %v420_v30  ;;  %v432_v34 = vadd.f32 0.001143296, %v431_v31  ;;  %v1073_v36 = vmul.f32 0.70710677, %v1070_v32 }
 0x188   :  { %v422_v37 = vmul.f32 %v421_v33, %v419_v27  ;;  %v433_v38 = vmul.f32 %v432_v34, %v419_v27  ;;  %v458_v39 = vmul.f32 %v1073_v36, %v1073_v36 }
 0x18a   :  { %v434_v40 = vadd.f32 0.014752088, %v433_v38  ;;  %v459_v42 = vmin.f32 %v458_v39, 16.0  ;;  %v423_v43 = vadd.f32 0.0036580483, %v422_v37 }
 0x18c   :  { %v435_v44 = vmul.f32 %v434_v40, %v419_v27  ;;  %v460_v45 = vmul.f32 2.1237322e-06, %v459_v42  ;;  %v471_v46 = vmul.f32 3.8918573e-05, %v459_v42  ;;  %v424_v54 = vmul.f32 %v423_v43, %v419_v27 }
 0x18e   :  { %v436_v47 = vadd.f32 0.112945676, %v435_v44  ;;  %v461_v50 = vadd.f32 0.00028619796, %v460_v45  ;;  %v472_v51 = vadd.f32 0.001143296, %v471_v46 }
 0x18f   :  { %v425_v62 = vadd.f32 0.05243302, %v424_v54 }
 0x190   :  { %v437_v55 = vmul.f32 %v436_v47, %v419_v27  ;;  %v462_v57 = vmul.f32 %v461_v50, %v459_v42  ;;  %v473_v58 = vmul.f32 %v472_v51, %v459_v42  ;;  %v414_v47 = vmul.f32 0.5, %v1063_v24 }
 0x191   :  { %v426_v6 = vmul.f32 %v425_v62, %v419_v27  ;;  %v415_v51 = vmul.f32 0.5, %v1070_v32 }
 0x192   :  { %v438_v56 = vadd.f32 0.4994258, %v437_v55  ;;  %v474_v60 = vadd.f32 0.014752088, %v473_v58  ;;  %v463_v0 = vadd.f32 0.0036580483, %v462_v57 }
 0x193   :  { %v427_v7 = vadd.f32 0.18741608, %v426_v6 }
 0x194   :  { %v439_v63 = vmul.f32 %v438_v56, %v419_v27  ;;  %v475_v2 = vmul.f32 %v474_v60, %v459_v42  ;;  %v464_v8 = vmul.f32 %v463_v0, %v459_v42 }
 0x195   :  { %v428_v16 = vmul.f32 %v427_v7, %v419_v27 }
 0x196   :  { %v440_v3 = vadd.f32 1.0, %v439_v63  ;;  %v476_v5 = vadd.f32 0.112945676, %v475_v2  ;;  %v465_v11 = vadd.f32 0.05243302, %v464_v8 }
 0x197   :  { %v429_v23 = vadd.f32 1.1283791, %v428_v16 }
 0x198   :  { %802 = vrcp.f32 %v440_v3  ;;  %v477_v10 = vmul.f32 %v476_v5, %v459_v42  ;;  %v466_v17 = vmul.f32 %v465_v11, %v459_v42  ;;  %v452_v19 = vand.u32 2147483648, %v440_v3 }
 0x199   :  { %v450_v21 = vand.u32 2147483647, %v440_v3  ;;  %vm446_vm9 = vweird.f32 %v440_v3  ;;  %v430_v29 = vmul.f32 %v429_v23, %v1066_v61 }
 0x19a   :  { %v478_v53 = vadd.f32 0.4994258, %v477_v10  ;;  %v467_v49 = vadd.f32 0.18741608, %v466_v17  ;;  %v453_v25 = vor.u32 1.1754944e-38, %v452_v19 }
 0x19b   :  { %vm451_vm11 = vcmp.eq.f32.partialorder %v450_v21, 8.507059e+37 }
 0x19c   :  { %v479_v12 = vmul.f32 %v478_v53, %v459_v42  ;;  %v468_v27 = vmul.f32 %v467_v49, %v459_v42 }
 0x19e   :  { %v803_v13 = vpop.eup %802  ;;  %v480_v15 = vadd.f32 1.0, %v479_v12  ;;  %v469_v37 = vadd.f32 1.1283791, %v468_v27 }
 0x19f   :  { %v442_v14 = vmul.f32 %v803_v13, %v440_v3  ;;  %vm447_vm8 = vweird.f32 %v803_v13 }
 0x1a0   :  { %804 = vrcp.f32 %v480_v15  ;;  %vm448_vm10 = vmor %vm446_vm9, %vm447_vm8  ;;  %v492_v35 = vand.u32 2147483648, %v480_v15  ;;  %v490_v39 = vand.u32 2147483647, %v480_v15  ;;  %vm486_vm13 = vweird.f32 %v480_v15 }
 0x1a1   :  { %v443_v18 = vsub.f32 1.0, %v442_v14  ;;  %v470_v44 = vmul.f32 %v469_v37, %v1073_v36 }
 0x1a2   :  { %v493_v43 = vor.u32 1.1754944e-38, %v492_v35  ;;  %vm491_vm15 = vcmp.eq.f32.partialorder %v490_v39, 8.507059e+37 }
 0x1a3   :  { %v444_v20 = vmul.f32 %v803_v13, %v443_v18 }
 0x1a5   :  { %v445_v52 = vadd.f32 %v803_v13, %v444_v20 }
 0x1a6   :  { %v805_v26 = vpop.eup %804 }
 0x1a7   :  { %v449_v28 = vsel %vm448_vm10, %v803_v13, %v445_v52  ;;  %v482_v31 = vmul.f32 %v805_v26, %v480_v15  ;;  %vm487_vm12 = vweird.f32 %v805_v26 }
 0x1a8   :  { %v454_v30 = vsel %vm451_vm11, %v453_v25, %v449_v28  ;;  %vm488_vm14 = vmor %vm486_vm13, %vm487_vm12 }
 0x1a9   :  { %v455_v33 = vmul.f32 %v454_v30, %v430_v29  ;;  %v483_v34 = vsub.f32 1.0, %v482_v31 }
 0x1ab   :  { %v484_v38 = vmul.f32 %v805_v26, %v483_v34  ;;  %v714_v40 = vclamps-f32 %v455_v33, 1.0 }
 0x1ad   :  { %v485_v41 = vadd.f32 %v805_v26, %v484_v38  ;;  %v498_v46 = vadd.f32 1.0, %v714_v40 }
 0x1af   :  { %v489_v45 = vsel %vm488_vm14, %v805_v26, %v485_v41  ;;  %v500_v50 = vmul.f32 %v498_v46, %v414_v47 }
 0x1b0   :  { %v494_v61 = vsel %vm491_vm15, %v493_v43, %v489_v45 }
 0x1b1   :  { %v495_v42 = vmul.f32 %v494_v61, %v470_v44  ;;  %v502_v57 = vadd.f32 %v500_v50, %v1054_v22 }
 0x1b3   :  { %v715_v48 = vclamps-f32 %v495_v42, 1.0 }
 0x1b5   :  { %v499_v54 = vadd.f32 1.0, %v715_v48 }
 0x1b7   :  { %v501_v55 = vmul.f32 %v499_v54, %v415_v51 }
 0x1b9   :  { %v503_v58 = vadd.f32 %v501_v55, %v1056_v1 }
 0x1bb   :  { %v504_v56 = vpack.c.bf16 %v503_v58, %v502_v57 }
 0x1bd   :  { %581 = vmatmul.bf16.vlgmr.msra.gmra.mxu3 %v504_v56 }
 0x240   :  { %v582_v36 = vpop.f32.mrf.mxu3 }
 0x241   :  { %v583_v24 = vadd.f32 %v797_v59, %v582_v36 }
 0x248   :  { %v584_v60 = vpop.f32.mrf.mxu3 }
 0x249   :  { %v585_v32 = vadd.f32 %v797_v59, %v584_v60 }
 0x24b   :  { %v784_v62 = vpack.c.bf16 %v585_v32, %v583_v24 }
 0x24d   :  { %785 = vst [vmem:[#allocation11] sm:$0xff] %v784_v62  }
 0x24e   :  { %603 = dma.vmem_to_hbm [thread:$0]  %s596_s29, 128, %s598_s9, [#allocation4], %s962_s1, %s962_s1, %s963_s16  }
 0x24f   :  { %956 = dma.done.wait [#allocation4], 128  }
 0x250   :  { %957 = vsyncadd [#allocation4], 4294967168 }
 0x251   :  { %608 = vsyncpa [#allocation3], 1 }
 0x252   :  { %609 = vsyncpa [#allocation6], 1 }
 0x253   :  { %610 = vsyncpa [#allocation9], 1 }
 0x254   :  { %611 = vsyncpa [#allocation4], 1 }

</bundles_post_ra>
